<compile_context>
chip_gen: v7x
topology: tpu7x:2x2x1
jax: 0.10.0
libtpu: 0.0.40
codegen_flags: <defaults>
</compile_context>

<pallas_src>
import functools

import jax
import jax.numpy as jnp
import numpy as np
from jax.experimental import pallas as pl
from jax.experimental.pallas import tpu as pltpu


def _round_up(a, b):
    return (a + b - 1) // b * b


def _cdiv(a, b):
    return (a + b - 1) // b


def _corr2d_kernel(x_ref, halo_ref, w_ref, b_ref, o_ref, *, kh, kw):
    """One output row strip of the cross-correlation.

    x_ref    : (tm, Wp)            main input strip (rows [i*tm, i*tm + tm))
    halo_ref : (1, hrows, Wp)      first `hrows` rows of the *next* strip
    w_ref    : (kh*kw,)  SMEM      flattened kernel taps
    b_ref    : (1,)      SMEM      scalar bias
    o_ref    : (tm, owp)           lane-dense (128-multiple) padded output strip
    """
    tm, owp = o_ref.shape
    xt = x_ref[...]                                  # single hoisted strip load
    if kh > 1:
        # Tile-aligned sublane concat: (tm, Wp) ++ (hrows, Wp), both 8-aligned.
        xv = jnp.concatenate([xt, halo_ref[0]], axis=0)
    else:
        xv = xt

    acc = jnp.zeros((tm, owp), jnp.float32)
    # Static unroll over the (small) tap window; each tap is a value slice of
    # the already-loaded strip + one VPU multiply-add with an SMEM scalar.
    for i in range(kh):
        for j in range(kw):
            acc = acc + xv[i:i + tm, j:j + owp] * w_ref[i * kw + j]

    o_ref[...] = acc + b_ref[0]


def conv2d_forward(x, weight, bias, *, tile_rows=256,
                   vmem_budget_bytes=8 * 1024 * 1024):
    """y = corr2d(x, weight) + bias   (forward of the PyTorch Conv2D module)."""
    x = jnp.asarray(x, jnp.float32)
    weight = jnp.asarray(weight, jnp.float32)
    bias = jnp.asarray(bias, jnp.float32).reshape((1,))

    H, W = x.shape
    kh, kw = weight.shape
    assert H >= kh and W >= kw, "kernel larger than input"
    oh, ow = H - kh + 1, W - kw + 1

    # Lane-dense padded widths: output width -> multiple of 128; input width
    # wide enough for every tap's column shift, also 128-aligned.
    owp = _round_up(ow, 128)
    Wp = _round_up(owp + kw - 1, 128)

    # Halo rows per strip, padded to a sublane multiple so the in-kernel
    # concatenate stays tile-aligned.
    hrows = _round_up(max(kh - 1, 1), 8)

    # Output rows per grid step: multiple of 8, >= hrows, capped so the
    # double-buffered f32 (input strip + output strip) working set stays inside
    # a budget that is safe on v7x (64 MiB VMEM) as well as v5e/v6e (128 MiB).
    row_bytes = 4 * (Wp + owp)
    tm_cap = max(8, (vmem_budget_bytes // (2 * row_bytes)) // 8 * 8)
    tm = min(_round_up(oh, 8), _round_up(tile_rows, 8), tm_cap)
    tm = max(tm, hrows, 8)

    n_tiles = _cdiv(oh, tm)
    oh_p = n_tiles * tm

    # Zero-padded input covering both the main strips and every strip's halo
    # source; padded rows/cols only feed output elements that get sliced off.
    x_p = jnp.zeros((oh_p + tm, Wp), jnp.float32).at[:H, :W].set(x)
    x_main = x_p[:oh_p]                                          # (oh_p, Wp)
    # halo[i] = first `hrows` rows of strip i+1 (cheap slice-of-reshape gather).
    halo = x_p[tm:].reshape(n_tiles, tm, Wp)[:, :hrows, :]       # (n_tiles, hrows, Wp)

    w_flat = weight.reshape((kh * kw,))

    kernel = functools.partial(_corr2d_kernel, kh=kh, kw=kw)

    flops = 2 * kh * kw * oh_p * owp
    bytes_accessed = 4 * (x_main.size + halo.size + oh_p * owp + kh * kw + 1)
    step_bytes = 4 * (tm * Wp + hrows * Wp + tm * owp)
    vmem_limit = int(min(64 * 2**20, max(32 * 2**20, 4 * step_bytes)))

    out_p = pl.pallas_call(
        kernel,
        out_shape=jax.ShapeDtypeStruct((oh_p, owp), jnp.float32),
        grid=(n_tiles,),
        in_specs=[
            pl.BlockSpec((tm, Wp), lambda i: (i, 0)),               # main strip
            pl.BlockSpec((1, hrows, Wp), lambda i: (i, 0, 0)),      # halo rows
            pl.BlockSpec(memory_space=pltpu.MemorySpace.SMEM),      # weight taps
            pl.BlockSpec(memory_space=pltpu.MemorySpace.SMEM),      # bias
        ],
        out_specs=pl.BlockSpec((tm, owp), lambda i: (i, 0)),
        compiler_params=pltpu.CompilerParams(
            dimension_semantics=("parallel",),      # row strips are independent
            vmem_limit_bytes=vmem_limit,
        ),
        cost_estimate=pl.CostEstimate(
            flops=flops, transcendentals=0, bytes_accessed=bytes_accessed),
    )(x_main, halo, w_flat, bias)

    # Slice off the lane / row padding.
    return out_p[:oh, :ow]


def _corr2d_ref(x, k):
    """Plain-JAX reference matching the PyTorch corr2d loop."""
    kh, kw = k.shape
    oh, ow = x.shape[0] - kh + 1, x.shape[1] - kw + 1
    y = jnp.zeros((oh, ow), jnp.float32)
    for i in range(kh):
        for j in range(kw):
            y = y + x[i:i + oh, j:j + ow] * k[i, j]
    return y


if __name__ == "__main__":
    key = jax.random.PRNGKey(0)
    k_w, k_b, k_x = jax.random.split(key, 3)

    # Conv2D(kernel_size=(2, 2)) with random weight/bias, small 2-D input.
    kernel_size = (2, 2)
    weight = jax.random.normal(k_w, kernel_size, jnp.float32)   # ~ torch.randn(kernel_size)
    bias = jax.random.normal(k_b, (1,), jnp.float32)            # ~ torch.randn(1)
    x = jax.random.normal(k_x, (8, 16), jnp.float32)

    y = conv2d_forward(x, weight, bias)
    jax.block_until_ready(y)
    y_ref = _corr2d_ref(x, weight) + bias[0]
    np.testing.assert_allclose(np.asarray(y), np.asarray(y_ref), rtol=1e-5, atol=1e-5)

    # The original script's example: k = [[1, -1]], x = ones(6, 8) (zero bias).
    k_edge = jnp.array([[1.0, -1.0]], jnp.float32)
    b_zero = jnp.zeros((1,), jnp.float32)
    x_ones = jnp.ones((6, 8), jnp.float32)
    y2 = conv2d_forward(x_ones, k_edge, b_zero)
    jax.block_until_ready(y2)
    np.testing.assert_allclose(np.asarray(y2), np.asarray(_corr2d_ref(x_ones, k_edge)),
                               rtol=1e-5, atol=1e-5)

    print("KERNEL_OK")
</pallas_src>

<mosaic_0001>
module attributes {stable_mosaic.version = 11 : i64} {
  func.func @_corr2d_kernel(%arg0: i32, %arg1: memref<8x256xf32, #tpu.memory_space<vmem>>, %arg2: memref<1x8x256xf32, #tpu.memory_space<vmem>>, %arg3: memref<4xf32, #tpu.memory_space<smem>>, %arg4: memref<1xf32, #tpu.memory_space<smem>>, %arg5: memref<8x128xf32, #tpu.memory_space<vmem>>) attributes {dimension_semantics = [#tpu.dimension_semantics<parallel>], iteration_bounds = array<i64: 1>, scalar_prefetch = 0 : i64, scratch_operands = 0 : i64, tpu.core_type = #tpu.core_type<tc>, window_params = [{transform_indices = @transform_0, window_bounds = array<i64: 8, 256>}, {transform_indices = @transform_1, window_bounds = array<i64: 1, 8, 256>}, {transform_indices = @transform_2, window_bounds = array<i64: 4>}, {transform_indices = @transform_3, window_bounds = array<i64: 1>}, {transform_indices = @transform_4, window_bounds = array<i64: 8, 128>}]} {
    %c0 = arith.constant 0 : index
    %c0_0 = arith.constant 0 : index
    %0 = vector.load %arg1[%c0, %c0_0] : memref<8x256xf32, #tpu.memory_space<vmem>>, vector<8x256xf32>
    %c0_1 = arith.constant 0 : index
    %c0_2 = arith.constant 0 : index
    %c0_3 = arith.constant 0 : index
    %1 = vector.load %arg2[%c0_1, %c0_2, %c0_3] : memref<1x8x256xf32, #tpu.memory_space<vmem>>, vector<1x8x256xf32>
    %2 = vector.shape_cast %1 : vector<1x8x256xf32> to vector<8x256xf32>
    %3 = tpu.concatenate %0, %2 in 0 : vector<8x256xf32>, vector<8x256xf32> -> vector<16x256xf32>
    %cst = arith.constant 0.000000e+00 : f32
    %4 = vector.broadcast %cst : f32 to vector<8x128xf32>
    %5 = vector.extract_strided_slice %3 {offsets = [0, 0], sizes = [8, 128], strides = [1, 1]} : vector<16x256xf32> to vector<8x128xf32>
    %c0_4 = arith.constant 0 : index
    %6 = memref.load %arg3[%c0_4] : memref<4xf32, #tpu.memory_space<smem>>
    %7 = vector.broadcast %6 : f32 to vector<8x128xf32>
    %8 = arith.mulf %5, %7 : vector<8x128xf32>
    %9 = arith.addf %4, %8 : vector<8x128xf32>
    %10 = vector.extract_strided_slice %3 {offsets = [0, 1], sizes = [8, 128], strides = [1, 1]} : vector<16x256xf32> to vector<8x128xf32>
    %c1 = arith.constant 1 : index
    %11 = memref.load %arg3[%c1] : memref<4xf32, #tpu.memory_space<smem>>
    %12 = vector.broadcast %11 : f32 to vector<8x128xf32>
    %13 = arith.mulf %10, %12 : vector<8x128xf32>
    %14 = arith.addf %9, %13 : vector<8x128xf32>
    %15 = vector.extract_strided_slice %3 {offsets = [1, 0], sizes = [8, 128], strides = [1, 1]} : vector<16x256xf32> to vector<8x128xf32>
    %c2 = arith.constant 2 : index
    %16 = memref.load %arg3[%c2] : memref<4xf32, #tpu.memory_space<smem>>
    %17 = vector.broadcast %16 : f32 to vector<8x128xf32>
    %18 = arith.mulf %15, %17 : vector<8x128xf32>
    %19 = arith.addf %14, %18 : vector<8x128xf32>
    %20 = vector.extract_strided_slice %3 {offsets = [1, 1], sizes = [8, 128], strides = [1, 1]} : vector<16x256xf32> to vector<8x128xf32>
    %c3 = arith.constant 3 : index
    %21 = memref.load %arg3[%c3] : memref<4xf32, #tpu.memory_space<smem>>
    %22 = vector.broadcast %21 : f32 to vector<8x128xf32>
    %23 = arith.mulf %20, %22 : vector<8x128xf32>
    %24 = arith.addf %19, %23 : vector<8x128xf32>
    %c0_5 = arith.constant 0 : index
    %25 = memref.load %arg4[%c0_5] : memref<1xf32, #tpu.memory_space<smem>>
    %26 = vector.broadcast %25 : f32 to vector<8x128xf32>
    %27 = arith.addf %24, %26 : vector<8x128xf32>
    %c0_6 = arith.constant 0 : index
    %c0_7 = arith.constant 0 : index
    %28 = vector.load %arg5[%c0_6, %c0_7] : memref<8x128xf32, #tpu.memory_space<vmem>>, vector<8x128xf32>
    tpu.vector_store %arg5[%c0_6, %c0_7], %27 {strides = array<i32>} : memref<8x128xf32, #tpu.memory_space<vmem>>, vector<8x128xf32>,
    return
  }
  func.func @transform_0(%arg0: i32) -> (i32, i32) {
    %c0_i32 = arith.constant 0 : i32
    %c0_i32_0 = arith.constant 0 : i32
    return %arg0, %c0_i32 : i32, i32
  }
  func.func @transform_1(%arg0: i32) -> (i32, i32, i32) {
    %c0_i32 = arith.constant 0 : i32
    %c0_i32_0 = arith.constant 0 : i32
    %c0_i32_1 = arith.constant 0 : i32
    return %arg0, %c0_i32, %c0_i32_0 : i32, i32, i32
  }
  func.func @transform_2(%arg0: i32) -> i32 {
    %c0_i32 = arith.constant 0 : i32
    %c0_i32_0 = arith.constant 0 : i32
    return %c0_i32 : i32
  }
  func.func @transform_3(%arg0: i32) -> i32 {
    %c0_i32 = arith.constant 0 : i32
    %c0_i32_0 = arith.constant 0 : i32
    return %c0_i32 : i32
  }
  func.func @transform_4(%arg0: i32) -> (i32, i32) {
    %c0_i32 = arith.constant 0 : i32
    %c0_i32_0 = arith.constant 0 : i32
    return %arg0, %c0_i32 : i32, i32
  }
}

</mosaic_0001>

<bundles_post_ra>
// kernel: tpu_custom_call.1
= control target key start
LH: loop header
LB: loop body
LE: loop exit
PB: predicated region body
PF: predicated region fallthrough
CT: control target
= control target key end

     0   :  { %10 = vsyncpa [#allocation4], 0  ;;  %s300_s0 = inlined_call_operand.hbm [shape: f32[8,256], index: 0, kind: input, shape index: {}]   ;;  %s301_s1 = inlined_call_operand.hbm [shape: f32[1,8,256], index: 1, kind: input, shape index: {}]   ;;  %s302_s2 = inlined_call_operand.vmem [shape: f32[4], index: 2, kind: input, shape index: {}]   ;;  %s303_s3 = inlined_call_operand.<no memory space> [shape: f32[1], index: 3, kind: input, shape index: {}]   ;;  %s304_s4 = inlined_call_operand.hbm [shape: f32[8,128], index: 4, kind: output, shape index: {}]  }
   0x1   :  { %11 = vsyncpa [#allocation8], 0 }
   0x2   :  { %12 = vsyncpa [#allocation6], 0 }
   0x3   :  { %13 = vsyncpa [#allocation5], 0  ;;  %s228_s15 = smov [#allocation3]   ;;  %s229_s17 = smov [#allocation7]  }
   0x4   :  { %s20_s16 = sshll.u32 %s228_s15, 4  ;;  %s30_s18 = sshll.u32 %s229_s17, 4  ;;  %s21_s16 = int_to_ptr.vmem [resolvable:$true] %s20_s16  ;;  %s31_s18 = int_to_ptr.vmem [resolvable:$true] %s30_s18 }
   0x5   :  { %s142_s21 = scalar_lea.hbm %s300_s0, 256 }
   0x6   :  { %p143_p0 = scmp.ne.s32.totalorder %s300_s0, %s142_s21  ;;  %p146_p1 = scmp.lt.u32.totalorder %s142_s21, %s300_s0 }
   0x8   :  { %p148_p2 = pnand %p146_p1, %p143_p0 }
   0xa   :  { %151 = shalt.err (!%p148_p2)
}
   0xb   :  { %s152_s26 = scalar_lea.vmem %s21_s16, 256  ;;  %p157_p4 = scmp.lt.s32.totalorder %s21_s16, %s21_s16 }
   0xc   :  { %p153_p3 = scmp.ne.s32.totalorder %s21_s16, %s152_s26  ;;  %p158_p5 = scmp.lt.s32.totalorder %s152_s26, %s152_s26 }
   0xe   :  { %p159_p6 = por %p158_p5, %p157_p4 }
  0x10   :  { %p160_p7 = pnand %p159_p6, %p153_p3 }
  0x12   :  { %163 = shalt.err (!%p160_p7)
}
  0x13   :  { %23 = dma.hbm_to_vmem [thread:$0]  %s300_s0, 256, %s21_s16, [#allocation4]  }
  0x14   :  { %s164_s5 = scalar_lea.hbm %s301_s1, 256 }
  0x15   :  { %p165_p8 = scmp.ne.s32.totalorder %s301_s1, %s164_s5  ;;  %p168_p9 = scmp.lt.u32.totalorder %s164_s5, %s301_s1 }
  0x17   :  { %p170_p10 = pnand %p168_p9, %p165_p8 }
  0x19   :  { %173 = shalt.err (!%p170_p10)
}
  0x1a   :  { %s174_s10 = scalar_lea.vmem %s31_s18, 256  ;;  %p179_p12 = scmp.lt.s32.totalorder %s31_s18, %s31_s18 }
  0x1b   :  { %p175_p11 = scmp.ne.s32.totalorder %s31_s18, %s174_s10  ;;  %p180_p13 = scmp.lt.s32.totalorder %s174_s10, %s174_s10 }
  0x1d   :  { %p181_p0 = por %p180_p13, %p179_p12 }
  0x1f   :  { %p182_p1 = pnand %p181_p0, %p175_p11 }
  0x21   :  { %185 = shalt.err (!%p182_p1)
}
  0x22   :  { %33 = dma.hbm_to_vmem [thread:$0]  %s301_s1, 256, %s31_s18, [#allocation8]  }
  0x23   :  { %s40_s14 = sshll.u32 %s302_s2, 4  ;;  %s41_s14 = int_to_ptr.vmem [resolvable:$true] %s40_s14 }
  0x24   :  { %s186_s15 = scalar_lea.vmem %s41_s14, 16  ;;  %p191_p3 = scmp.lt.s32.totalorder %s41_s14, %s41_s14 }
  0x25   :  { %p187_p2 = scmp.ne.s32.totalorder %s41_s14, %s186_s15  ;;  %p192_p4 = scmp.lt.s32.totalorder %s186_s15, %s186_s15 }
  0x27   :  { %p193_p5 = por %p192_p4, %p191_p3 }
  0x29   :  { %p194_p6 = pnand %p193_p5, %p187_p2 }
  0x2b   :  { %197 = shalt.err (!%p194_p6)
}
  0x2c   :  { %s230_s16 = smov [#allocation9]  }
  0x2d   :  { %43 = dma.vmem_to_smem %s41_s14, 16, %s230_s16, [#allocation6]  }
  0x2e   :  { %220 = dma.done.wait [#allocation4], 256  }
  0x2f   :  { %221 = vsyncadd [#allocation4], 4294967040 }
  0x30   :  { %222 = dma.done.wait [#allocation8], 256  }
  0x31   :  { %223 = vsyncadd [#allocation8], 4294967040 }
  0x32   :  { %224 = dma.done.wait [#allocation6], 16  }
  0x33   :  { %225 = vsyncadd [#allocation6], 4294967280 }
  0x34   :  { %55 = sfence }
  0x35   :  { %s134_s1 = sld [smem:[#allocation9 + $0x1]]  ;;  %s136_s17 = sld [smem:[#allocation9 + $0x3]]  ;;  %v56_v0 = vld [vmem:[#allocation3] sm:$0xff]  ;;  %v57_v1 = vld [vmem:[#allocation3 + $0x8] sm:$0xff]  ;;  %v58_v2 = vld [vmem:[#allocation7] sm:$0xff]  ;;  %vm84_vm0 = vcmask 1046528   ;;  %v114_v34 = vstv %s303_s3 }
  0x36   :  { %s135_s2 = sld [smem:[#allocation9 + $0x2]]  ;;  %v59_v4 = vld [vmem:[#allocation7 + $0x8] sm:$0xff]  ;;  %s231_s18 = smov 127   ;;  %vm74_vm1 = vcmask 1039360  }
  0x37   :  { %s60_s19 = sld [smem:[#allocation9]]  ;;  %s232_s22 = smov [#allocation10]  }
  0x38   :  { %s123_s23 = sshll.u32 %s232_s22, 4  ;;  %s124_s23 = int_to_ptr.vmem [resolvable:$true] %s123_s23 }
  0x39   :  { %s198_s24 = scalar_lea.vmem %s124_s23, 128  ;;  %p203_p8 = scmp.lt.s32.totalorder %s124_s23, %s124_s23 }
  0x3a   :  { %p199_p7 = scmp.ne.s32.totalorder %s124_s23, %s198_s24  ;;  %p204_p9 = scmp.lt.s32.totalorder %s198_s24, %s198_s24 }
  0x3b   :  { %v65_v3 = vstv %s134_s1  ;;  %v91_v6 = vstv %s136_s17 }
  0x3c   :  { %v66_v5 = vmul.f32 %v65_v3, %v56_v0  ;;  %v79_v7 = vstv %s135_s2  ;;  %v93_v8 = vmul.f32 %v91_v6, %v57_v1  ;;  %v92_v10 = vmul.f32 %v91_v6, %v56_v0  ;;  %p205_p10 = por %p204_p9, %p203_p8 }
  0x3d   :  { %v81_v9 = vmul.f32 %v79_v7, %v58_v2  ;;  %v94_v11 = vmul.f32 %v91_v6, %v58_v2  ;;  %v67_v12 = vmul.f32 %v65_v3, %v57_v1  ;;  %v80_v13 = vmul.f32 %v79_v7, %v56_v0 }
  0x3e   :  { %70 = vrot.lane.b32.xlu0 %v66_v5, %s231_s18  ;;  %v95_v14 = vmul.f32 %v91_v6, %v59_v4  ;;  %v103_v15 = vrot.slane %v93_v8, 1  ;;  %v100_v17 = vrot.slane %v92_v10, 1  ;;  %v61_v24 = vstv %s60_s19  ;;  %p206_p11 = pnand %p205_p10, %p199_p7 }
  0x3f   :  { %v86_v16 = vrot.slane %v81_v9, 1  ;;  %v101_v18 = vrot.slane %v94_v11, 1  ;;  %v85_v19 = vrot.slane %v80_v13, 1  ;;  %v62_v26 = vmul.f32 %v61_v24, %v56_v0 }
  0x40   :  { %v104_v20 = vrot.slane %v95_v14, 1 }
  0x41   :  { %v102_v21 = vsel %vm84_vm0, %v100_v17, %v101_v18  ;;  %v87_v22 = vsel %vm84_vm0, %v85_v19, %v86_v16 }
  0x42   :  { %106 = vrot.lane.b32.xlu1 %v102_v21, %s231_s18  ;;  %72 = vrot.lane.b32.xlu0 %v67_v12, %s231_s18  ;;  %v105_v23 = vsel %vm84_vm0, %v103_v15, %v104_v20 }
  0x46   :  { %108 = vrot.lane.b32.xlu1 %v105_v23, %s231_s18 }
  0xb0   :  { %v71_v25 = vpop.permute.xlu0 %70 }
  0xb4   :  { %v107_v27 = vpop.permute.xlu1 %106  ;;  %v73_v28 = vpop.permute.xlu0 %72 }
  0xb5   :  { %v75_v29 = vsel %vm74_vm1, %v71_v25, %v73_v28 }
  0xb6   :  { %v77_v30 = vadd.f32 %v75_v29, %v62_v26 }
  0xb8   :  { %v109_v31 = vpop.permute.xlu1 %108  ;;  %v89_v32 = vadd.f32 %v87_v22, %v77_v30 }
  0xb9   :  { %v110_v33 = vsel %vm74_vm1, %v107_v27, %v109_v31 }
  0xba   :  { %v112_v35 = vadd.f32 %v110_v33, %v89_v32 }
  0xbc   :  { %v115_v36 = vadd.f32 %v114_v34, %v112_v35 }
  0xbe   :  { %116 = vst [vmem:[#allocation10] sm:$0xff] %v115_v36 }
  0xbf   :  { %209 = shalt.err (!%p206_p11)
}
  0xc0   :  { %s210_s27 = scalar_lea.hbm %s304_s4, 128 }
  0xc1   :  { %p211_p12 = scmp.ne.s32.totalorder %s304_s4, %s210_s27  ;;  %p214_p13 = scmp.lt.u32.totalorder %s210_s27, %s304_s4 }
  0xc3   :  { %p216_p0 = pnand %p214_p13, %p211_p12 }
  0xc5   :  { %219 = shalt.err (!%p216_p0)
}
  0xc6   :  { %126 = dma.vmem_to_hbm [thread:$0]  %s124_s23, 128, %s304_s4, [#allocation5]  }
  0xc7   :  { %226 = dma.done.wait [#allocation5], 128  }
  0xc8   :  { %227 = vsyncadd [#allocation5], 4294967168 }
  0xc9   :  { %130 = vsyncpa [#allocation4], 1 }
  0xca   :  { %131 = vsyncpa [#allocation8], 1 }
  0xcb   :  { %132 = vsyncpa [#allocation5], 1 }
  0xcc   :  { %133 = vsyncpa [#allocation6], 1 }

</bundles_post_ra>
